<compile_context>
chip_gen: v5e
topology: v5e:2x2
jax: 0.10.0
libtpu: 0.0.40
codegen_flags: <defaults>
</compile_context>

<pallas_src>
import jax
import jax.numpy as jnp
from jax.experimental import pallas as pl
from jax.experimental.pallas import tpu as pltpu

# ----------------------------- configuration -------------------------------
B = 2            # batch
C_BACKBONE = 8   # backbone.num_channels
H = 8            # feature map height
W = 8            # feature map width
HIDDEN = 32      # transformer.d_model
NUM_QUERIES = 8
NUM_OBJ_CLASSES = 7    # -> obj_class_embed outputs NUM_OBJ_CLASSES + 1
NUM_VERB_CLASSES = 6
NUM_DEC_LAYERS = 2     # leading dim of hs

OBJ_C = NUM_OBJ_CLASSES + 1   # 8
VERB_C = NUM_VERB_CLASSES     # 6

# Packed stage-1 weight / output-slab column layout (lane-dense, 128 wide).
SLAB_COLS = 128
OBJ_OFF = 0                 # obj logits        [0, 8)
VERB_OFF = OBJ_OFF + OBJ_C  # verb logits       [8, 14)
BOX_OFF = 16                # sub box [16,20), obj box [20,24)
S1_OFF = 32                 # sub-bbox MLP layer-1 pre-act [32, 64)
O1_OFF = 64                 # obj-bbox MLP layer-1 pre-act [64, 96)


# --------------------------- Pallas kernel 1 --------------------------------
# input_proj: 1x1 Conv2d(C_BACKBONE -> HIDDEN) == channels-last matmul.
def _conv1x1_kernel(x_ref, w_ref, b_ref, o_ref):
    # x: [TM, Cin] f32, w: [Cin, Cout] bf16, b: [1, Cout] f32
    o_ref[...] = (
        jnp.dot(x_ref[...].astype(jnp.bfloat16), w_ref[...],
                preferred_element_type=jnp.float32)
        + b_ref[...]
    )


def input_proj(src_nchw, w_io, b):
    """1x1 conv; returns channels-last [B, H*W, HIDDEN] (no NCHW round-trip)."""
    bn, cin, hh, ww = src_nchw.shape
    cout = w_io.shape[1]
    rows = bn * hh * ww
    x = jnp.transpose(src_nchw, (0, 2, 3, 1)).reshape(rows, cin)
    w_bf = w_io.astype(jnp.bfloat16)

    tm = 64 if rows % 64 == 0 else rows   # row tile (multiple of 8)
    out = pl.pallas_call(
        _conv1x1_kernel,
        out_shape=jax.ShapeDtypeStruct((rows, cout), jnp.float32),
        grid=(rows // tm,),
        in_specs=[
            pl.BlockSpec((tm, cin), lambda i: (i, 0)),
            pl.BlockSpec((cin, cout), lambda i: (0, 0)),
            pl.BlockSpec((1, cout), lambda i: (0, 0)),
        ],
        out_specs=pl.BlockSpec((tm, cout), lambda i: (i, 0)),
        compiler_params=pltpu.CompilerParams(
            dimension_semantics=("parallel",)),
    )(x, w_bf, b)
    return out.reshape(bn, hh * ww, cout)


# --------------------------- Pallas kernel 2 --------------------------------
# Fused prediction heads with packed weights and a lane-dense output slab.
def _heads_kernel(hs_ref, w1_ref, b1_ref, w2_ref, b2_ref, w3_ref, b3_ref,
                  out_ref):
    hs = hs_ref[...].astype(jnp.bfloat16)                       # [TN, D]

    # Stage 1: one fused matmul for obj logits | verb logits | ws1 | wo1.
    y1 = (jnp.dot(hs, w1_ref[...], preferred_element_type=jnp.float32)
          + b1_ref[...])                                        # [TN, 128] f32

    # Stage 2: block-diagonal [ws2 0; 0 wo2] on concat(relu(s1), relu(o1)).
    x2 = jnp.maximum(y1[:, S1_OFF:O1_OFF + HIDDEN], 0.0)        # [TN, 64]
    y2 = jnp.maximum(
        jnp.dot(x2.astype(jnp.bfloat16), w2_ref[...],
                preferred_element_type=jnp.float32) + b2_ref[...],
        0.0)                                                    # [TN, 64]

    # Stage 3: block-diagonal [ws3 0; 0 wo3] -> 8 box coords, then sigmoid.
    y3 = jax.nn.sigmoid(
        jnp.dot(y2.astype(jnp.bfloat16), w3_ref[...],
                preferred_element_type=jnp.float32) + b3_ref[...])  # [TN, 8]

    # Lane-dense output: one full 128-lane store (carries obj/verb logits in
    # cols [0,14)), plus a single 8-lane store for the two bbox outputs.
    out_ref[...] = y1
    out_ref[:, BOX_OFF:BOX_OFF + 8] = y3


def _block_diag2(a, b):
    za = jnp.zeros((a.shape[0], b.shape[1]), a.dtype)
    zb = jnp.zeros((b.shape[0], a.shape[1]), b.dtype)
    return jnp.concatenate(
        [jnp.concatenate([a, za], axis=1),
         jnp.concatenate([zb, b], axis=1)], axis=0)


def _pack_head_params(p):
    f32 = jnp.float32
    d = HIDDEN
    # Stage-1 packed weight [D, 128]: obj | verb | pad | ws1 | wo1 | pad
    pad_a = jnp.zeros((d, S1_OFF - (OBJ_C + VERB_C)), f32)
    pad_b = jnp.zeros((d, SLAB_COLS - (O1_OFF + d)), f32)
    w1p = jnp.concatenate(
        [p["w_obj"], p["w_verb"], pad_a, p["ws1"], p["wo1"], pad_b], axis=1)
    b1p = jnp.concatenate(
        [p["b_obj"], p["b_verb"], pad_a[:1], p["bs1"], p["bo1"], pad_b[:1]],
        axis=1)
    # Stage-2 block-diagonal [64, 64], stage-3 block-diagonal [64, 8].
    w2p = _block_diag2(p["ws2"], p["wo2"])
    b2p = jnp.concatenate([p["bs2"], p["bo2"]], axis=1)
    w3p = _block_diag2(p["ws3"], p["wo3"])
    b3p = jnp.concatenate([p["bs3"], p["bo3"]], axis=1)
    return (w1p.astype(jnp.bfloat16), b1p,
            w2p.astype(jnp.bfloat16), b2p,
            w3p.astype(jnp.bfloat16), b3p)


def run_heads(hs, params):
    # hs: [L, B, Q, D]  ->  flatten to [N, D]
    L, Bn, Q, D = hs.shape
    n = L * Bn * Q
    hs_flat = hs.reshape(n, D)
    w1p, b1p, w2p, b2p, w3p, b3p = _pack_head_params(params)

    tn = 16 if n % 16 == 0 else n   # row tile (multiple of 8)
    slab = pl.pallas_call(
        _heads_kernel,
        out_shape=jax.ShapeDtypeStruct((n, SLAB_COLS), jnp.float32),
        grid=(n // tn,),
        in_specs=[
            pl.BlockSpec((tn, D), lambda i: (i, 0)),
            pl.BlockSpec(w1p.shape, lambda i: (0, 0)),
            pl.BlockSpec(b1p.shape, lambda i: (0, 0)),
            pl.BlockSpec(w2p.shape, lambda i: (0, 0)),
            pl.BlockSpec(b2p.shape, lambda i: (0, 0)),
            pl.BlockSpec(w3p.shape, lambda i: (0, 0)),
            pl.BlockSpec(b3p.shape, lambda i: (0, 0)),
        ],
        out_specs=pl.BlockSpec((tn, SLAB_COLS), lambda i: (i, 0)),
        compiler_params=pltpu.CompilerParams(
            dimension_semantics=("parallel",)),
    )(hs_flat, w1p, b1p, w2p, b2p, w3p, b3p)

    obj_logits = slab[:, OBJ_OFF:OBJ_OFF + OBJ_C].reshape(L, Bn, Q, OBJ_C)
    verb_logits = slab[:, VERB_OFF:VERB_OFF + VERB_C].reshape(L, Bn, Q, VERB_C)
    sub_box = slab[:, BOX_OFF:BOX_OFF + 4].reshape(L, Bn, Q, 4)
    obj_box = slab[:, BOX_OFF + 4:BOX_OFF + 8].reshape(L, Bn, Q, 4)
    return obj_logits, verb_logits, sub_box, obj_box


# ----------------------- deterministic parameter init -----------------------
def init_params(key):
    ks = iter(jax.random.split(key, 32))

    def dense(cin, cout):
        w = 0.02 * jax.random.normal(next(ks), (cin, cout), jnp.float32)
        b = 0.01 * jax.random.normal(next(ks), (1, cout), jnp.float32)
        return w, b

    p = {}
    # input_proj: Conv2d(C_BACKBONE, HIDDEN, kernel_size=1)
    p["w_proj"], p["b_proj"] = dense(C_BACKBONE, HIDDEN)
    # query_embed: Embedding(NUM_QUERIES, HIDDEN)
    p["query_embed"] = jax.random.normal(next(ks), (NUM_QUERIES, HIDDEN), jnp.float32)
    # obj_class_embed / verb_class_embed
    p["w_obj"], p["b_obj"] = dense(HIDDEN, OBJ_C)
    p["w_verb"], p["b_verb"] = dense(HIDDEN, VERB_C)
    # sub_bbox_embed: MLP(HIDDEN, HIDDEN, 4, 3)
    p["ws1"], p["bs1"] = dense(HIDDEN, HIDDEN)
    p["ws2"], p["bs2"] = dense(HIDDEN, HIDDEN)
    p["ws3"], p["bs3"] = dense(HIDDEN, 4)
    # obj_bbox_embed: MLP(HIDDEN, HIDDEN, 4, 3)
    p["wo1"], p["bo1"] = dense(HIDDEN, HIDDEN)
    p["wo2"], p["bo2"] = dense(HIDDEN, HIDDEN)
    p["wo3"], p["bo3"] = dense(HIDDEN, 4)
    return p


# --------------------------- external-module stubs ---------------------------
def stub_backbone(samples):
    # TODO(synk): the backbone is an external injected nn.Module (e.g. ResNet);
    # here the input IS the last feature map, mask is all-valid, pos is a
    # deterministic sinusoidal stand-in returned channels-last [B, H*W, D].
    bn, _, hh, ww = samples.shape
    mask = jnp.zeros((bn, hh, ww), dtype=bool)
    yy = jnp.arange(hh, dtype=jnp.float32)[:, None]          # [H, 1]
    xx = jnp.arange(ww, dtype=jnp.float32)[None, :]          # [1, W]
    freqs = jnp.arange(HIDDEN // 2, dtype=jnp.float32) + 1.0
    pos_y = jnp.broadcast_to(jnp.sin(yy[..., None] * freqs / HIDDEN),
                             (hh, ww, HIDDEN // 2))
    pos_x = jnp.broadcast_to(jnp.cos(xx[..., None] * freqs / HIDDEN),
                             (hh, ww, HIDDEN // 2))
    pos = jnp.concatenate([pos_y, pos_x], axis=-1)           # [H, W, HIDDEN]
    pos = jnp.broadcast_to(pos.reshape(1, hh * ww, HIDDEN),
                           (bn, hh * ww, HIDDEN)).astype(jnp.float32)
    return samples, mask, pos


def stub_transformer(src_flat, mask, query_embed, pos_flat):
    # TODO(synk): the real DETR encoder/decoder transformer is an external
    # injected module; this is a deterministic plain-JAX stand-in producing
    # hs of shape [num_dec_layers, B, num_queries, d_model].  It consumes the
    # channels-last flat layout directly (no NCHW round-trip).
    bn, hw, dd = src_flat.shape
    memory = src_flat + pos_flat                              # [B, HW, D]
    mask_bias = jnp.where(mask.reshape(bn, 1, hw), -1e9, 0.0)
    x = jnp.broadcast_to(query_embed[None], (bn, NUM_QUERIES, dd))
    layers = []
    for _ in range(NUM_DEC_LAYERS):
        attn = jax.nn.softmax(
            jnp.einsum("bqd,bkd->bqk", x, memory) / jnp.sqrt(float(dd)) + mask_bias,
            axis=-1,
        )
        x = jnp.tanh(x + jnp.einsum("bqk,bkd->bqd", attn, memory))
        layers.append(x)
    return jnp.stack(layers, axis=0)


# ------------------------------ DETRHOI forward ------------------------------
def detr_hoi_forward(samples, params):
    src, mask, pos = stub_backbone(samples)
    proj = input_proj(src, params["w_proj"], params["b_proj"])        # Pallas conv1x1
    hs = stub_transformer(proj, mask, params["query_embed"], pos)     # [L,B,Q,D]
    obj_logits, verb_logits, sub_boxes, obj_boxes = run_heads(hs, params)  # Pallas heads
    out = {
        "pred_obj_logits": obj_logits[-1],
        "pred_verb_logits": verb_logits[-1],
        "pred_sub_boxes": sub_boxes[-1],
        "pred_obj_boxes": obj_boxes[-1],
    }
    return out, hs, proj


# -------------------------- reference (plain JAX) ----------------------------
def _ref_heads(hs, p):
    def lin(x, w, b):
        return x @ w + b

    def mlp3(x, w1, b1, w2, b2, w3, b3):
        x = jax.nn.relu(lin(x, w1, b1))
        x = jax.nn.relu(lin(x, w2, b2))
        return lin(x, w3, b3)

    return (
        lin(hs, p["w_obj"], p["b_obj"]),
        lin(hs, p["w_verb"], p["b_verb"]),
        jax.nn.sigmoid(mlp3(hs, p["ws1"], p["bs1"], p["ws2"], p["bs2"], p["ws3"], p["bs3"])),
        jax.nn.sigmoid(mlp3(hs, p["wo1"], p["bo1"], p["wo2"], p["bo2"], p["wo3"], p["bo3"])),
    )


def _ref_input_proj(src_nchw, w, b):
    bn, cin, hh, ww = src_nchw.shape
    x = jnp.transpose(src_nchw, (0, 2, 3, 1)).reshape(bn, hh * ww, cin)
    return x @ w + b


if __name__ == "__main__":
    key = jax.random.PRNGKey(0)
    k_param, k_input = jax.random.split(key)
    params = init_params(k_param)
    samples = jax.random.normal(k_input, (B, C_BACKBONE, H, W), jnp.float32)

    out, hs, proj = detr_hoi_forward(samples, params)
    jax.block_until_ready(out)

    # sanity check against plain-JAX references (bf16 matmul operands in the
    # kernels -> relaxed tolerance vs f32 reference).
    ref_proj = _ref_input_proj(samples, params["w_proj"], params["b_proj"])
    ref_obj, ref_verb, ref_sub, ref_objb = _ref_heads(hs, params)

    assert out["pred_obj_logits"].shape == (B, NUM_QUERIES, OBJ_C)
    assert out["pred_verb_logits"].shape == (B, NUM_QUERIES, VERB_C)
    assert out["pred_sub_boxes"].shape == (B, NUM_QUERIES, 4)
    assert out["pred_obj_boxes"].shape == (B, NUM_QUERIES, 4)
    assert jnp.allclose(proj, ref_proj, atol=1e-2, rtol=1e-2)
    assert jnp.allclose(out["pred_obj_logits"], ref_obj[-1], atol=1e-2, rtol=1e-2)
    assert jnp.allclose(out["pred_verb_logits"], ref_verb[-1], atol=1e-2, rtol=1e-2)
    assert jnp.allclose(out["pred_sub_boxes"], ref_sub[-1], atol=1e-2, rtol=1e-2)
    assert jnp.allclose(out["pred_obj_boxes"], ref_objb[-1], atol=1e-2, rtol=1e-2)

    print("KERNEL_OK")
</pallas_src>

<mosaic_0001>
module attributes {stable_mosaic.version = 11 : i64} {
  func.func @_conv1x1_kernel(%arg0: i32, %arg1: memref<64x8xf32, #tpu.memory_space<vmem>>, %arg2: memref<8x32xbf16, #tpu.memory_space<vmem>>, %arg3: memref<1x32xf32, #tpu.memory_space<vmem>>, %arg4: memref<64x32xf32, #tpu.memory_space<vmem>>) attributes {dimension_semantics = [#tpu.dimension_semantics<parallel>], iteration_bounds = array<i64: 2>, scalar_prefetch = 0 : i64, scratch_operands = 0 : i64, tpu.core_type = #tpu.core_type<tc>, window_params = [{transform_indices = @transform_0, window_bounds = array<i64: 64, 8>}, {pipeline_mode = #tpu.pipeline_mode<synchronous>, transform_indices = @transform_1, window_bounds = array<i64: 8, 32>}, {pipeline_mode = #tpu.pipeline_mode<synchronous>, transform_indices = @transform_2, window_bounds = array<i64: 1, 32>}, {transform_indices = @transform_3, window_bounds = array<i64: 64, 32>}]} {
    %c0 = arith.constant 0 : index
    %c0_0 = arith.constant 0 : index
    %0 = vector.load %arg1[%c0, %c0_0] : memref<64x8xf32, #tpu.memory_space<vmem>>, vector<64x8xf32>
    %1 = arith.truncf %0 : vector<64x8xf32> to vector<64x8xbf16>
    %c0_1 = arith.constant 0 : index
    %c0_2 = arith.constant 0 : index
    %2 = vector.load %arg2[%c0_1, %c0_2] : memref<8x32xbf16, #tpu.memory_space<vmem>>, vector<8x32xbf16>
    %cst = arith.constant dense<0.000000e+00> : vector<64x32xf32>
    %3 = tpu.matmul %1, %2, %cst {dimension_numbers = #tpu.dot_dimension_numbers<[1], [0], [0], [1], [0, 0, 1, 1], [], []>} : vector<64x8xbf16>, vector<8x32xbf16>, vector<64x32xf32> -> vector<64x32xf32>
    %c0_3 = arith.constant 0 : index
    %c0_4 = arith.constant 0 : index
    %4 = vector.load %arg3[%c0_3, %c0_4] : memref<1x32xf32, #tpu.memory_space<vmem>>, vector<1x32xf32>
    %5 = vector.broadcast %4 : vector<1x32xf32> to vector<64x32xf32>
    %6 = arith.addf %3, %5 : vector<64x32xf32>
    %c0_5 = arith.constant 0 : index
    %c0_6 = arith.constant 0 : index
    %7 = vector.load %arg4[%c0_5, %c0_6] : memref<64x32xf32, #tpu.memory_space<vmem>>, vector<64x32xf32>
    tpu.vector_store %arg4[%c0_5, %c0_6], %6 {strides = array<i32>} : memref<64x32xf32, #tpu.memory_space<vmem>>, vector<64x32xf32>,
    return
  }
  func.func @transform_0(%arg0: i32) -> (i32, i32) {
    %c0_i32 = arith.constant 0 : i32
    %c0_i32_0 = arith.constant 0 : i32
    return %arg0, %c0_i32 : i32, i32
  }
  func.func @transform_1(%arg0: i32) -> (i32, i32) {
    %c0_i32 = arith.constant 0 : i32
    %c0_i32_0 = arith.constant 0 : i32
    %c0_i32_1 = arith.constant 0 : i32
    return %c0_i32, %c0_i32_0 : i32, i32
  }
  func.func @transform_2(%arg0: i32) -> (i32, i32) {
    %c0_i32 = arith.constant 0 : i32
    %c0_i32_0 = arith.constant 0 : i32
    %c0_i32_1 = arith.constant 0 : i32
    return %c0_i32, %c0_i32_0 : i32, i32
  }
  func.func @transform_3(%arg0: i32) -> (i32, i32) {
    %c0_i32 = arith.constant 0 : i32
    %c0_i32_0 = arith.constant 0 : i32
    return %arg0, %c0_i32 : i32, i32
  }
}

</mosaic_0001>

<bundles_post_ra>
// kernel: tpu_custom_call.1
= control target key start
LH: loop header
LB: loop body
LE: loop exit
PB: predicated region body
PF: predicated region fallthrough
CT: control target
= control target key end

     0   :  { %s358_s12 = smov 0   ;;  %s389_s0 = inlined_call_operand.vmem [shape: f32[128,8], index: 0, kind: input, shape index: {}]   ;;  %s390_s1 = inlined_call_operand.vmem [shape: bf16[8,32], index: 1, kind: input, shape index: {}]   ;;  %s391_s2 = inlined_call_operand.vmem [shape: f32[1,32], index: 2, kind: input, shape index: {}]   ;;  %s392_s3 = inlined_call_operand.vmem [shape: f32[128,32], index: 3, kind: output, shape index: {}]  }
   0x1 LB: > { %s303_s13 = sadd.s32 4294967295, %s336_s12   ;;  %p307_p0 = scmp.ge.s32.totalorder %s336_s12, 1  ;;  %s336_s12 = sphi %s358_s12, %s13_s12  }
   0x2   : > { %p138_p1 = scmp.lt.s32.totalorder %s336_s12, 3 }
   0x4   : > { %p139_p2 = pnand %p307_p0, %p138_p1 }
   0x5   : > { %s308_s16 = sshll.u32 (!%p139_p2), %s303_s13, 3 }
   0x6   : > { %142 = sbr.rel (%p139_p2) target bundleno = 162 (0xa2), region = 32  ;;  %p163_p3 = scmp.lt.s32.totalorder (!%p139_p2), %s308_s16, 15 }
   0xb   : > { %v187_v0 = vld [vmem:[%s390_s1] sm:$0xf]  ;;  %vm205_vm0 = vcmask 1043456   ;;  %s394_s16 = smov (!%p163_p3, %s308_s16), 15  ;;  %vm192_vm1 = vcmask 64512   ;;  %vm238_vm2 = vcmask 261120  }
   0xc   : > { %v207_v1 = vsel %vm205_vm0, %v187_v0, 0  ;;  %s309_s17 = sshll.u32 %s394_s16, 3  ;;  %v329_v14 = vld [vmem:[%s391_s2] ss:$0 sm:$0xff] }
   0xd   : > { %216 = vmatpush.bf16.msra.mxu0 %v207_v1  ;;  %318 = vmatpush.bf16.msra.mxu1 %v207_v1  ;;  %s166_s20 = scalar_lea.vmem %s389_s0, %s309_s17  ;;  %s172_s25 = scalar_lea.vmem %s392_s3, %s309_s17 }
   0xe   : > { %319 = vmatpush.bf16.msra.mxu2 %v207_v1  ;;  %320 = vmatpush.bf16.msra.mxu3 %v207_v1  ;;  %v175_v2 = vld [vmem:[%s166_s20] sm:$0xff]  ;;  %v176_v3 = vld [vmem:[%s166_s20 + $0x8] sm:$0xff]  ;;  %v177_v4 = vld [vmem:[%s166_s20 + $0x10] sm:$0xff] }
   0xf   : > { %v183_v5 = vpack.c.bf16 %v176_v3, %v175_v2  ;;  %v178_v6 = vld [vmem:[%s166_s20 + $0x18] sm:$0xff]  ;;  %v179_v7 = vld [vmem:[%s166_s20 + $0x20] sm:$0xff]  ;;  %v180_v8 = vld [vmem:[%s166_s20 + $0x28] sm:$0xff] }
  0x10   : > { %v184_v9 = vpack.c.bf16 %v178_v6, %v177_v4  ;;  %v185_v10 = vpack.c.bf16 %v180_v8, %v179_v7  ;;  %v181_v11 = vld [vmem:[%s166_s20 + $0x30] sm:$0xff]  ;;  %v182_v12 = vld [vmem:[%s166_s20 + $0x38] sm:$0xff] }
  0x11   : > { %312 = vmatmul.msk.bf16.vlgmr.msra.gmra.mxu0 %vm192_vm1, %v183_v5  ;;  %v186_v13 = vpack.c.bf16 %v182_v12, %v181_v11 }
  0x12   : > { %313 = vmatmul.msk.bf16.vlgmr.msra.gmra.mxu1 %vm192_vm1, %v184_v9  ;;  %314 = vmatmul.msk.bf16.vlgmr.msra.gmra.mxu2 %vm192_vm1, %v185_v10 }
  0x13   : > { %315 = vmatmul.msk.bf16.vlgmr.msra.gmra.mxu3 %vm192_vm1, %v186_v13 }
  0x8e   : > { %v218_v15 = vpop.f32.mrf.mxu0 }
  0x8f   : > { %v219_v16 = vadd.f32 %v329_v14, %v218_v15  ;;  %v223_v17 = vpop.f32.mrf.mxu1 }
  0x90   : > { %v224_v18 = vadd.f32 %v329_v14, %v223_v17 }
  0x91   : > { %239 = vst.msk [vmem:[%s172_s25] sm:$0xff] %vm238_vm2, %v219_v16 }
  0x92   : > { %241 = vst.msk [vmem:[%s172_s25 + $0x10] sm:$0xff] %vm238_vm2, %v224_v18 }
  0x95   : > { %v228_v19 = vpop.f32.mrf.mxu2 }
  0x96   : > { %v229_v20 = vadd.f32 %v329_v14, %v228_v19  ;;  %v233_v21 = vpop.f32.mrf.mxu3  ;;  %v220_v22 = vpop.f32.mrf.mxu0 }
  0x97   : > { %v234_v23 = vadd.f32 %v329_v14, %v233_v21  ;;  %v221_v24 = vadd.f32 %v329_v14, %v220_v22  ;;  %v225_v25 = vpop.f32.mrf.mxu1 }
  0x98   : > { %243 = vst.msk [vmem:[%s172_s25 + $0x20] sm:$0xff] %vm238_vm2, %v229_v20  ;;  %v226_v26 = vadd.f32 %v329_v14, %v225_v25 }
  0x99   : > { %245 = vst.msk [vmem:[%s172_s25 + $0x30] sm:$0xff] %vm238_vm2, %v234_v23 }
  0x9a   : > { %240 = vst.msk [vmem:[%s172_s25 + $0x8] sm:$0xff] %vm238_vm2, %v221_v24 }
  0x9b   : > { %242 = vst.msk [vmem:[%s172_s25 + $0x18] sm:$0xff] %vm238_vm2, %v226_v26 }
  0x9d   : > { %v230_v27 = vpop.f32.mrf.mxu2 }
  0x9e   : > { %v231_v28 = vadd.f32 %v329_v14, %v230_v27  ;;  %v235_v29 = vpop.f32.mrf.mxu3 }
  0x9f   : > { %v236_v30 = vadd.f32 %v329_v14, %v235_v29 }
  0xa0   : > { %244 = vst.msk [vmem:[%s172_s25 + $0x28] sm:$0xff] %vm238_vm2, %v231_v28 }
  0xa1   : > { %246 = vst.msk [vmem:[%s172_s25 + $0x38] sm:$0xff] %vm238_vm2, %v236_v30 }
  0xa2 PF: > { %s13_s12 = sadd.s32 1, %s336_s12  }
  0xa3   : > { %p10_p4 = scmp.ge.s32.totalorder %s13_s12, 4  }
  0xa5   :  { %12 = sbr.rel (!%p10_p4) target bundleno = 1 (0x1), region = 62 }

</bundles_post_ra>
